<compile_context>
chip_gen: v5e
topology: v5e:2x2
jax: 0.10.0
libtpu: 0.0.40
codegen_flags: <defaults>
</compile_context>

<pallas_src>
import functools

import jax
import jax.numpy as jnp
import numpy as np
from jax.experimental import pallas as pl
from jax.experimental.pallas import tpu as pltpu


def _nsmc_kernel(num_layers, seq_len, tb, mxu_dtype, *refs):
    """refs = [ids, embed, (wih_T, whh_T, bih, bhh) * L, fcw_T, fcb, out, scr]."""
    ids_ref = refs[0]                               # (1, T, tb) int32  VMEM
    embed_ref = refs[1]                             # (V, E)
    layer_refs = refs[2:2 + 4 * num_layers]
    fcw_ref = refs[2 + 4 * num_layers]              # (H, O)
    fcb_ref = refs[3 + 4 * num_layers]              # (1, O) f32
    out_ref = refs[4 + 4 * num_layers]              # (tb, O)
    scr = refs[5 + 4 * num_layers]                  # (T*tb, H) VMEM scratch

    vocab = embed_ref.shape[0]
    hidden = scr.shape[-1]
    cdt = mxu_dtype if mxu_dtype is not None else jnp.float32

    def _mm(a, b):
        return jnp.dot(a.astype(cdt), b.astype(cdt),
                       preferred_element_type=jnp.float32)

    # ---- Embedding gather: ONE vectorized one-hot compare + MXU matmul. ----
    ids_tile = ids_ref[0]                                        # (T, tb)
    iota_v = jax.lax.broadcasted_iota(jnp.int32, (seq_len, tb, vocab), 2)
    onehot = jnp.where(iota_v == ids_tile[:, :, None],
                       jnp.ones((), cdt), jnp.zeros((), cdt))
    onehot = onehot.reshape(seq_len * tb, vocab)                 # row = t*tb + b
    in_flat = _mm(onehot, embed_ref[...])                        # (T*tb, E) f32

    h = None
    for layer in range(num_layers):
        wih_t = layer_refs[4 * layer + 0][...]                   # (in, H)
        whh_t = layer_refs[4 * layer + 1][...].astype(cdt)       # (H, H)
        # Pre-sum biases once per layer; fold into the input projection.
        bias = layer_refs[4 * layer + 2][...] + layer_refs[4 * layer + 3][...]
        last_layer = layer == num_layers - 1

        if layer > 0:
            # Previous layer's output sequence (written back into scr below).
            in_flat = scr[...]                                   # (T*tb, H)

        # Hoisted input projection: ONE (T*tb, in) @ (in, H) matmul per layer.
        scr[...] = (_mm(in_flat, wih_t) + bias).astype(scr.dtype)

        h = jnp.zeros((tb, hidden), jnp.float32)
        # T is small here -> static unroll.  Switch to
        # lax.fori_loop(..., unroll=4..8) once T is realistic (>~32) to bound
        # code size / vreg pressure.
        for t in range(seq_len):
            r0 = t * tb                                          # tb % 8 == 0 -> aligned
            xp = scr[r0:r0 + tb, :].astype(jnp.float32)          # (tb, H)
            h = jnp.tanh(xp + jnp.dot(h.astype(cdt), whh_t,
                                      preferred_element_type=jnp.float32))
            if not last_layer:                                   # last layer only
                scr[r0:r0 + tb, :] = h.astype(scr.dtype)         # needs h[T-1]

    # Dropout == identity (eval mode).  FC on last timestep, then sigmoid.
    logits = _mm(h, fcw_ref[...]) + fcb_ref[...]                 # (tb, O) f32
    out_ref[...] = jax.nn.sigmoid(logits).astype(out_ref.dtype)


def nsmc_forward(token_ids, params, num_layers, *, mxu_dtype=None,
                 batch_block=None):
    """Full forward (embedding + multi-layer tanh-RNN + FC + Sigmoid) in one
    Pallas kernel.  mxu_dtype=jnp.bfloat16 feeds bf16 MXU operands with f32
    accumulation / elementwise (fine on v5e/v6e/v7x).  batch_block (multiple
    of 8; ~256 recommended at realistic batch) tiles the batch over a parallel
    grid axis so v7x's two TensorCores both get work."""
    embed = params["embed"]
    batch, seq_len = token_ids.shape
    hidden = params["whh0_T"].shape[0]
    out_node = params["fcb"].shape[-1]

    # Pad the batch to a sublane multiple so every per-timestep scratch slice
    # is (8,128)-aligned (straight vld/vst, no relayout copies).
    if batch_block is not None:
        assert batch_block % 8 == 0, "batch_block must be a multiple of 8"
        tb = batch_block
    else:
        tb = max(8, ((batch + 7) // 8) * 8)
    b_pad = ((batch + tb - 1) // tb) * tb
    grid = (b_pad // tb,)

    wdt = mxu_dtype if mxu_dtype is not None else jnp.float32
    # Pre-cast MXU operands ONCE here (halves weight DMA + VMEM in bf16 path).
    ins = [embed.astype(wdt)]
    for layer in range(num_layers):
        ins += [params[f"wih{layer}_T"].astype(wdt),
                params[f"whh{layer}_T"].astype(wdt),
                params[f"bih{layer}"].astype(jnp.float32),
                params[f"bhh{layer}"].astype(jnp.float32)]
    ins += [params["fcw_T"].astype(wdt), params["fcb"].astype(jnp.float32)]

    # Token ids -> (grid, T, tb): each grid step gets its tile's ids in VMEM,
    # t-major so row t*tb+b of the flat activations maps to (t, b).
    ids = jnp.pad(token_ids.astype(jnp.int32), ((0, b_pad - batch), (0, 0)))
    ids_tiles = ids.T.reshape(seq_len, grid[0], tb).transpose(1, 0, 2)

    # Constant-index weight/table blocks: whole array resident every step.
    weight_specs = [pl.BlockSpec(a.shape, lambda i: (0, 0)) for a in ins]
    in_specs = [pl.BlockSpec((1, seq_len, tb), lambda i: (i, 0, 0))] + weight_specs

    scr_dt = mxu_dtype if mxu_dtype is not None else jnp.float32

    # Explicit VMEM budget (defaults are only 16 MiB v5e / 32 MiB v6e+v7x);
    # conservative cap keeps it valid on every generation.
    est = sum(2 * int(a.size) * a.dtype.itemsize for a in ins)        # dbl-buffered
    est += 2 * int(ids_tiles.size) * 4 // max(grid[0], 1)
    est += seq_len * tb * hidden * jnp.dtype(scr_dt).itemsize         # scratch
    est += 2 * tb * out_node * 4
    vmem_limit = int(min(max(4 * est, 16 * 2**20), 48 * 2**20))

    kernel = functools.partial(_nsmc_kernel, num_layers, seq_len, tb, mxu_dtype)

    out = pl.pallas_call(
        kernel,
        out_shape=jax.ShapeDtypeStruct((b_pad, out_node), jnp.float32),
        grid=grid,
        in_specs=in_specs,
        out_specs=pl.BlockSpec((tb, out_node), lambda i: (i, 0)),
        scratch_shapes=[pltpu.VMEM((seq_len * tb, hidden), scr_dt)],
        compiler_params=pltpu.CompilerParams(
            dimension_semantics=("parallel",),
            vmem_limit_bytes=vmem_limit),
    )(ids_tiles, *ins)
    return out[:batch]


def ref_forward(token_ids, params, num_layers):
    """Pure-JAX f32 reference mirroring the PyTorch forward (model='RNN', eval)."""
    h_seq = params["embed"][token_ids].astype(jnp.float32)
    batch, seq_len, _ = h_seq.shape
    for layer in range(num_layers):
        wih_t = params[f"wih{layer}_T"]
        whh_t = params[f"whh{layer}_T"]
        bih = params[f"bih{layer}"]
        bhh = params[f"bhh{layer}"]
        h = jnp.zeros((batch, whh_t.shape[0]), jnp.float32)
        outs = []
        for t in range(seq_len):
            h = jnp.tanh(h_seq[:, t, :] @ wih_t + bih + h @ whh_t + bhh)
            outs.append(h)
        h_seq = jnp.stack(outs, axis=1)
    logits = h_seq[:, -1, :] @ params["fcw_T"] + params["fcb"]
    return jax.nn.sigmoid(logits)


def init_params(key, num_vocab, embedding_dim, hidden_dim, num_layers, out_node):
    """PyTorch-style init: N(0,1) embedding (nn.Embedding default) and
    uniform(-1/sqrt(H), 1/sqrt(H)) RNN/Linear weights, stored pre-transposed."""
    params = {}
    bound = 1.0 / np.sqrt(hidden_dim)
    key, k = jax.random.split(key)
    params["embed"] = jax.random.normal(k, (num_vocab, embedding_dim), jnp.float32)
    for layer in range(num_layers):
        in_dim = embedding_dim if layer == 0 else hidden_dim
        key, k1, k2, k3, k4 = jax.random.split(key, 5)
        params[f"wih{layer}_T"] = jax.random.uniform(
            k1, (in_dim, hidden_dim), jnp.float32, -bound, bound)
        params[f"whh{layer}_T"] = jax.random.uniform(
            k2, (hidden_dim, hidden_dim), jnp.float32, -bound, bound)
        params[f"bih{layer}"] = jax.random.uniform(
            k3, (1, hidden_dim), jnp.float32, -bound, bound)
        params[f"bhh{layer}"] = jax.random.uniform(
            k4, (1, hidden_dim), jnp.float32, -bound, bound)
    key, k1, k2 = jax.random.split(key, 3)
    fc_bound = 1.0 / np.sqrt(hidden_dim)
    params["fcw_T"] = jax.random.uniform(
        k1, (hidden_dim, out_node), jnp.float32, -fc_bound, fc_bound)
    params["fcb"] = jax.random.uniform(
        k2, (1, out_node), jnp.float32, -fc_bound, fc_bound)
    return params


if __name__ == "__main__":
    NUM_VOCAB = 100
    EMBEDDING_DIM = 32
    HIDDEN_DIM = 32
    NUM_LAYERS = 2
    OUT_NODE = 1
    BATCH = 2
    SEQ = 8

    root = jax.random.PRNGKey(0)
    k_params, k_ids = jax.random.split(root)
    params = init_params(k_params, NUM_VOCAB, EMBEDDING_DIM, HIDDEN_DIM,
                         NUM_LAYERS, OUT_NODE)
    token_ids = jax.random.randint(k_ids, (BATCH, SEQ), 0, NUM_VOCAB, jnp.int32)

    expected = jax.block_until_ready(ref_forward(token_ids, params, NUM_LAYERS))

    # Exact-precision path (f32 matmuls, f32 scratch): parity with reference.
    out_f32 = jax.block_until_ready(nsmc_forward(token_ids, params, NUM_LAYERS))
    np.testing.assert_allclose(np.asarray(out_f32), np.asarray(expected),
                               rtol=1e-5, atol=1e-5)

    # Mixed-precision path (bf16 MXU operands + bf16 scratch, f32 accumulate /
    # elementwise): loose tolerance, checks the optimized branch runs and is sane.
    out_bf16 = jax.block_until_ready(
        nsmc_forward(token_ids, params, NUM_LAYERS, mxu_dtype=jnp.bfloat16))
    np.testing.assert_allclose(np.asarray(out_bf16), np.asarray(expected),
                               rtol=0.0, atol=5e-2)

    print("KERNEL_OK")
</pallas_src>

<mosaic_0001>
module attributes {stable_mosaic.version = 11 : i64} {
  func.func @_nsmc_kernel(%arg0: i32, %arg1: memref<1x8x8xi32, #tpu.memory_space<vmem>>, %arg2: memref<100x32xf32, #tpu.memory_space<vmem>>, %arg3: memref<32x32xf32, #tpu.memory_space<vmem>>, %arg4: memref<32x32xf32, #tpu.memory_space<vmem>>, %arg5: memref<1x32xf32, #tpu.memory_space<vmem>>, %arg6: memref<1x32xf32, #tpu.memory_space<vmem>>, %arg7: memref<32x32xf32, #tpu.memory_space<vmem>>, %arg8: memref<32x32xf32, #tpu.memory_space<vmem>>, %arg9: memref<1x32xf32, #tpu.memory_space<vmem>>, %arg10: memref<1x32xf32, #tpu.memory_space<vmem>>, %arg11: memref<32x1xf32, #tpu.memory_space<vmem>>, %arg12: memref<1x1xf32, #tpu.memory_space<vmem>>, %arg13: memref<8x1xf32, #tpu.memory_space<vmem>>, %arg14: memref<64x32xf32, #tpu.memory_space<vmem>>) attributes {dimension_semantics = [#tpu.dimension_semantics<parallel>], iteration_bounds = array<i64: 1>, scalar_prefetch = 0 : i64, scratch_operands = 1 : i64, tpu.core_type = #tpu.core_type<tc>, window_params = [{transform_indices = @transform_0, window_bounds = array<i64: 1, 8, 8>}, {pipeline_mode = #tpu.pipeline_mode<synchronous>, transform_indices = @transform_1, window_bounds = array<i64: 100, 32>}, {pipeline_mode = #tpu.pipeline_mode<synchronous>, transform_indices = @transform_2, window_bounds = array<i64: 32, 32>}, {pipeline_mode = #tpu.pipeline_mode<synchronous>, transform_indices = @transform_3, window_bounds = array<i64: 32, 32>}, {pipeline_mode = #tpu.pipeline_mode<synchronous>, transform_indices = @transform_4, window_bounds = array<i64: 1, 32>}, {pipeline_mode = #tpu.pipeline_mode<synchronous>, transform_indices = @transform_5, window_bounds = array<i64: 1, 32>}, {pipeline_mode = #tpu.pipeline_mode<synchronous>, transform_indices = @transform_6, window_bounds = array<i64: 32, 32>}, {pipeline_mode = #tpu.pipeline_mode<synchronous>, transform_indices = @transform_7, window_bounds = array<i64: 32, 32>}, {pipeline_mode = #tpu.pipeline_mode<synchronous>, transform_indices = @transform_8, window_bounds = array<i64: 1, 32>}, {pipeline_mode = #tpu.pipeline_mode<synchronous>, transform_indices = @transform_9, window_bounds = array<i64: 1, 32>}, {pipeline_mode = #tpu.pipeline_mode<synchronous>, transform_indices = @transform_10, window_bounds = array<i64: 32, 1>}, {pipeline_mode = #tpu.pipeline_mode<synchronous>, transform_indices = @transform_11, window_bounds = array<i64: 1, 1>}, {transform_indices = @transform_12, window_bounds = array<i64: 8, 1>}]} {
    %c0 = arith.constant 0 : index
    %c0_0 = arith.constant 0 : index
    %c0_1 = arith.constant 0 : index
    %0 = vector.load %arg1[%c0, %c0_0, %c0_1] : memref<1x8x8xi32, #tpu.memory_space<vmem>>, vector<1x8x8xi32>
    %1 = vector.shape_cast %0 : vector<1x8x8xi32> to vector<8x8xi32>
    %2 = tpu.iota {dimensions = array<i32: 2>} : vector<8x8x100xi32>
    %3 = vector.shape_cast %1 : vector<8x8xi32> to vector<8x8x1xi32>
    %4 = vector.broadcast %3 : vector<8x8x1xi32> to vector<8x8x100xi32>
    %5 = arith.cmpi eq, %2, %4 : vector<8x8x100xi32>
    %cst = arith.constant 1.000000e+00 : f32
    %cst_2 = arith.constant 0.000000e+00 : f32
    %6 = vector.broadcast %cst : f32 to vector<8x8x100xf32>
    %7 = vector.broadcast %cst_2 : f32 to vector<8x8x100xf32>
    %8 = arith.select %5, %6, %7 : vector<8x8x100xi1>, vector<8x8x100xf32>
    %9 = vector.shape_cast %8 : vector<8x8x100xf32> to vector<64x100xf32>
    %c0_3 = arith.constant 0 : index
    %c0_4 = arith.constant 0 : index
    %10 = vector.load %arg2[%c0_3, %c0_4] : memref<100x32xf32, #tpu.memory_space<vmem>>, vector<100x32xf32>
    %cst_5 = arith.constant dense<0.000000e+00> : vector<64x32xf32>
    %11 = tpu.matmul %9, %10, %cst_5 {dimension_numbers = #tpu.dot_dimension_numbers<[1], [0], [0], [1], [0, 0, 1, 1], [], []>} : vector<64x100xf32>, vector<100x32xf32>, vector<64x32xf32> -> vector<64x32xf32>
    %c0_6 = arith.constant 0 : index
    %c0_7 = arith.constant 0 : index
    %12 = vector.load %arg3[%c0_6, %c0_7] : memref<32x32xf32, #tpu.memory_space<vmem>>, vector<32x32xf32>
    %c0_8 = arith.constant 0 : index
    %c0_9 = arith.constant 0 : index
    %13 = vector.load %arg4[%c0_8, %c0_9] : memref<32x32xf32, #tpu.memory_space<vmem>>, vector<32x32xf32>
    %c0_10 = arith.constant 0 : index
    %c0_11 = arith.constant 0 : index
    %14 = vector.load %arg5[%c0_10, %c0_11] : memref<1x32xf32, #tpu.memory_space<vmem>>, vector<1x32xf32>
    %c0_12 = arith.constant 0 : index
    %c0_13 = arith.constant 0 : index
    %15 = vector.load %arg6[%c0_12, %c0_13] : memref<1x32xf32, #tpu.memory_space<vmem>>, vector<1x32xf32>
    %16 = arith.addf %14, %15 : vector<1x32xf32>
    %cst_14 = arith.constant dense<0.000000e+00> : vector<64x32xf32>
    %17 = tpu.matmul %11, %12, %cst_14 {dimension_numbers = #tpu.dot_dimension_numbers<[1], [0], [0], [1], [0, 0, 1, 1], [], []>} : vector<64x32xf32>, vector<32x32xf32>, vector<64x32xf32> -> vector<64x32xf32>
    %18 = vector.broadcast %16 : vector<1x32xf32> to vector<64x32xf32>
    %19 = arith.addf %17, %18 : vector<64x32xf32>
    %c0_15 = arith.constant 0 : index
    %c0_16 = arith.constant 0 : index
    %20 = vector.load %arg14[%c0_15, %c0_16] : memref<64x32xf32, #tpu.memory_space<vmem>>, vector<64x32xf32>
    tpu.vector_store %arg14[%c0_15, %c0_16], %19 {strides = array<i32>} : memref<64x32xf32, #tpu.memory_space<vmem>>, vector<64x32xf32>,
    %cst_17 = arith.constant 0.000000e+00 : f32
    %21 = vector.broadcast %cst_17 : f32 to vector<8x32xf32>
    %c0_18 = arith.constant 0 : index
    %c0_19 = arith.constant 0 : index
    %22 = vector.load %arg14[%c0_18, %c0_19] : memref<64x32xf32, #tpu.memory_space<vmem>>, vector<8x32xf32>
    %cst_20 = arith.constant dense<0.000000e+00> : vector<8x32xf32>
    %23 = tpu.matmul %21, %13, %cst_20 {dimension_numbers = #tpu.dot_dimension_numbers<[1], [0], [0], [1], [0, 0, 1, 1], [], []>} : vector<8x32xf32>, vector<32x32xf32>, vector<8x32xf32> -> vector<8x32xf32>
    %24 = arith.addf %22, %23 : vector<8x32xf32>
    %25 = math.tanh %24 : vector<8x32xf32>
    %c0_21 = arith.constant 0 : index
    %c0_22 = arith.constant 0 : index
    %26 = vector.load %arg14[%c0_21, %c0_22] : memref<64x32xf32, #tpu.memory_space<vmem>>, vector<8x32xf32>
    tpu.vector_store %arg14[%c0_21, %c0_22], %25 {strides = array<i32>} : memref<64x32xf32, #tpu.memory_space<vmem>>, vector<8x32xf32>,
    %c8 = arith.constant 8 : index
    %c0_23 = arith.constant 0 : index
    %27 = vector.load %arg14[%c8, %c0_23] : memref<64x32xf32, #tpu.memory_space<vmem>>, vector<8x32xf32>
    %cst_24 = arith.constant dense<0.000000e+00> : vector<8x32xf32>
    %28 = tpu.matmul %25, %13, %cst_24 {dimension_numbers = #tpu.dot_dimension_numbers<[1], [0], [0], [1], [0, 0, 1, 1], [], []>} : vector<8x32xf32>, vector<32x32xf32>, vector<8x32xf32> -> vector<8x32xf32>
    %29 = arith.addf %27, %28 : vector<8x32xf32>
    %30 = math.tanh %29 : vector<8x32xf32>
    %c8_25 = arith.constant 8 : index
    %c0_26 = arith.constant 0 : index
    %31 = vector.load %arg14[%c8_25, %c0_26] : memref<64x32xf32, #tpu.memory_space<vmem>>, vector<8x32xf32>
    tpu.vector_store %arg14[%c8_25, %c0_26], %30 {strides = array<i32>} : memref<64x32xf32, #tpu.memory_space<vmem>>, vector<8x32xf32>,
    %c16 = arith.constant 16 : index
    %c0_27 = arith.constant 0 : index
    %32 = vector.load %arg14[%c16, %c0_27] : memref<64x32xf32, #tpu.memory_space<vmem>>, vector<8x32xf32>
    %cst_28 = arith.constant dense<0.000000e+00> : vector<8x32xf32>
    %33 = tpu.matmul %30, %13, %cst_28 {dimension_numbers = #tpu.dot_dimension_numbers<[1], [0], [0], [1], [0, 0, 1, 1], [], []>} : vector<8x32xf32>, vector<32x32xf32>, vector<8x32xf32> -> vector<8x32xf32>
    %34 = arith.addf %32, %33 : vector<8x32xf32>
    %35 = math.tanh %34 : vector<8x32xf32>
    %c16_29 = arith.constant 16 : index
    %c0_30 = arith.constant 0 : index
    %36 = vector.load %arg14[%c16_29, %c0_30] : memref<64x32xf32, #tpu.memory_space<vmem>>, vector<8x32xf32>
    tpu.vector_store %arg14[%c16_29, %c0_30], %35 {strides = array<i32>} : memref<64x32xf32, #tpu.memory_space<vmem>>, vector<8x32xf32>,
    %c24 = arith.constant 24 : index
    %c0_31 = arith.constant 0 : index
    %37 = vector.load %arg14[%c24, %c0_31] : memref<64x32xf32, #tpu.memory_space<vmem>>, vector<8x32xf32>
    %cst_32 = arith.constant dense<0.000000e+00> : vector<8x32xf32>
    %38 = tpu.matmul %35, %13, %cst_32 {dimension_numbers = #tpu.dot_dimension_numbers<[1], [0], [0], [1], [0, 0, 1, 1], [], []>} : vector<8x32xf32>, vector<32x32xf32>, vector<8x32xf32> -> vector<8x32xf32>
    %39 = arith.addf %37, %38 : vector<8x32xf32>
    %40 = math.tanh %39 : vector<8x32xf32>
    %c24_33 = arith.constant 24 : index
    %c0_34 = arith.constant 0 : index
    %41 = vector.load %arg14[%c24_33, %c0_34] : memref<64x32xf32, #tpu.memory_space<vmem>>, vector<8x32xf32>
    tpu.vector_store %arg14[%c24_33, %c0_34], %40 {strides = array<i32>} : memref<64x32xf32, #tpu.memory_space<vmem>>, vector<8x32xf32>,
    %c32 = arith.constant 32 : index
    %c0_35 = arith.constant 0 : index
    %42 = vector.load %arg14[%c32, %c0_35] : memref<64x32xf32, #tpu.memory_space<vmem>>, vector<8x32xf32>
    %cst_36 = arith.constant dense<0.000000e+00> : vector<8x32xf32>
    %43 = tpu.matmul %40, %13, %cst_36 {dimension_numbers = #tpu.dot_dimension_numbers<[1], [0], [0], [1], [0, 0, 1, 1], [], []>} : vector<8x32xf32>, vector<32x32xf32>, vector<8x32xf32> -> vector<8x32xf32>
    %44 = arith.addf %42, %43 : vector<8x32xf32>
    %45 = math.tanh %44 : vector<8x32xf32>
    %c32_37 = arith.constant 32 : index
    %c0_38 = arith.constant 0 : index
    %46 = vector.load %arg14[%c32_37, %c0_38] : memref<64x32xf32, #tpu.memory_space<vmem>>, vector<8x32xf32>
    tpu.vector_store %arg14[%c32_37, %c0_38], %45 {strides = array<i32>} : memref<64x32xf32, #tpu.memory_space<vmem>>, vector<8x32xf32>,
    %c40 = arith.constant 40 : index
    %c0_39 = arith.constant 0 : index
    %47 = vector.load %arg14[%c40, %c0_39] : memref<64x32xf32, #tpu.memory_space<vmem>>, vector<8x32xf32>
    %cst_40 = arith.constant dense<0.000000e+00> : vector<8x32xf32>
    %48 = tpu.matmul %45, %13, %cst_40 {dimension_numbers = #tpu.dot_dimension_numbers<[1], [0], [0], [1], [0, 0, 1, 1], [], []>} : vector<8x32xf32>, vector<32x32xf32>, vector<8x32xf32> -> vector<8x32xf32>
    %49 = arith.addf %47, %48 : vector<8x32xf32>
    %50 = math.tanh %49 : vector<8x32xf32>
    %c40_41 = arith.constant 40 : index
    %c0_42 = arith.constant 0 : index
    %51 = vector.load %arg14[%c40_41, %c0_42] : memref<64x32xf32, #tpu.memory_space<vmem>>, vector<8x32xf32>
    tpu.vector_store %arg14[%c40_41, %c0_42], %50 {strides = array<i32>} : memref<64x32xf32, #tpu.memory_space<vmem>>, vector<8x32xf32>,
    %c48 = arith.constant 48 : index
    %c0_43 = arith.constant 0 : index
    %52 = vector.load %arg14[%c48, %c0_43] : memref<64x32xf32, #tpu.memory_space<vmem>>, vector<8x32xf32>
    %cst_44 = arith.constant dense<0.000000e+00> : vector<8x32xf32>
    %53 = tpu.matmul %50, %13, %cst_44 {dimension_numbers = #tpu.dot_dimension_numbers<[1], [0], [0], [1], [0, 0, 1, 1], [], []>} : vector<8x32xf32>, vector<32x32xf32>, vector<8x32xf32> -> vector<8x32xf32>
    %54 = arith.addf %52, %53 : vector<8x32xf32>
    %55 = math.tanh %54 : vector<8x32xf32>
    %c48_45 = arith.constant 48 : index
    %c0_46 = arith.constant 0 : index
    %56 = vector.load %arg14[%c48_45, %c0_46] : memref<64x32xf32, #tpu.memory_space<vmem>>, vector<8x32xf32>
    tpu.vector_store %arg14[%c48_45, %c0_46], %55 {strides = array<i32>} : memref<64x32xf32, #tpu.memory_space<vmem>>, vector<8x32xf32>,
    %c56 = arith.constant 56 : index
    %c0_47 = arith.constant 0 : index
    %57 = vector.load %arg14[%c56, %c0_47] : memref<64x32xf32, #tpu.memory_space<vmem>>, vector<8x32xf32>
    %cst_48 = arith.constant dense<0.000000e+00> : vector<8x32xf32>
    %58 = tpu.matmul %55, %13, %cst_48 {dimension_numbers = #tpu.dot_dimension_numbers<[1], [0], [0], [1], [0, 0, 1, 1], [], []>} : vector<8x32xf32>, vector<32x32xf32>, vector<8x32xf32> -> vector<8x32xf32>
    %59 = arith.addf %57, %58 : vector<8x32xf32>
    %60 = math.tanh %59 : vector<8x32xf32>
    %c56_49 = arith.constant 56 : index
    %c0_50 = arith.constant 0 : index
    %61 = vector.load %arg14[%c56_49, %c0_50] : memref<64x32xf32, #tpu.memory_space<vmem>>, vector<8x32xf32>
    tpu.vector_store %arg14[%c56_49, %c0_50], %60 {strides = array<i32>} : memref<64x32xf32, #tpu.memory_space<vmem>>, vector<8x32xf32>,
    %c0_51 = arith.constant 0 : index
    %c0_52 = arith.constant 0 : index
    %62 = vector.load %arg7[%c0_51, %c0_52] : memref<32x32xf32, #tpu.memory_space<vmem>>, vector<32x32xf32>
    %c0_53 = arith.constant 0 : index
    %c0_54 = arith.constant 0 : index
    %63 = vector.load %arg8[%c0_53, %c0_54] : memref<32x32xf32, #tpu.memory_space<vmem>>, vector<32x32xf32>
    %c0_55 = arith.constant 0 : index
    %c0_56 = arith.constant 0 : index
    %64 = vector.load %arg9[%c0_55, %c0_56] : memref<1x32xf32, #tpu.memory_space<vmem>>, vector<1x32xf32>
    %c0_57 = arith.constant 0 : index
    %c0_58 = arith.constant 0 : index
    %65 = vector.load %arg10[%c0_57, %c0_58] : memref<1x32xf32, #tpu.memory_space<vmem>>, vector<1x32xf32>
    %66 = arith.addf %64, %65 : vector<1x32xf32>
    %c0_59 = arith.constant 0 : index
    %c0_60 = arith.constant 0 : index
    %67 = vector.load %arg14[%c0_59, %c0_60] : memref<64x32xf32, #tpu.memory_space<vmem>>, vector<64x32xf32>
    %cst_61 = arith.constant dense<0.000000e+00> : vector<64x32xf32>
    %68 = tpu.matmul %67, %62, %cst_61 {dimension_numbers = #tpu.dot_dimension_numbers<[1], [0], [0], [1], [0, 0, 1, 1], [], []>} : vector<64x32xf32>, vector<32x32xf32>, vector<64x32xf32> -> vector<64x32xf32>
    %69 = vector.broadcast %66 : vector<1x32xf32> to vector<64x32xf32>
    %70 = arith.addf %68, %69 : vector<64x32xf32>
    %c0_62 = arith.constant 0 : index
    %c0_63 = arith.constant 0 : index
    %71 = vector.load %arg14[%c0_62, %c0_63] : memref<64x32xf32, #tpu.memory_space<vmem>>, vector<64x32xf32>
    tpu.vector_store %arg14[%c0_62, %c0_63], %70 {strides = array<i32>} : memref<64x32xf32, #tpu.memory_space<vmem>>, vector<64x32xf32>,
    %cst_64 = arith.constant 0.000000e+00 : f32
    %72 = vector.broadcast %cst_64 : f32 to vector<8x32xf32>
    %c0_65 = arith.constant 0 : index
    %c0_66 = arith.constant 0 : index
    %73 = vector.load %arg14[%c0_65, %c0_66] : memref<64x32xf32, #tpu.memory_space<vmem>>, vector<8x32xf32>
    %cst_67 = arith.constant dense<0.000000e+00> : vector<8x32xf32>
    %74 = tpu.matmul %72, %63, %cst_67 {dimension_numbers = #tpu.dot_dimension_numbers<[1], [0], [0], [1], [0, 0, 1, 1], [], []>} : vector<8x32xf32>, vector<32x32xf32>, vector<8x32xf32> -> vector<8x32xf32>
    %75 = arith.addf %73, %74 : vector<8x32xf32>
    %76 = math.tanh %75 : vector<8x32xf32>
    %c8_68 = arith.constant 8 : index
    %c0_69 = arith.constant 0 : index
    %77 = vector.load %arg14[%c8_68, %c0_69] : memref<64x32xf32, #tpu.memory_space<vmem>>, vector<8x32xf32>
    %cst_70 = arith.constant dense<0.000000e+00> : vector<8x32xf32>
    %78 = tpu.matmul %76, %63, %cst_70 {dimension_numbers = #tpu.dot_dimension_numbers<[1], [0], [0], [1], [0, 0, 1, 1], [], []>} : vector<8x32xf32>, vector<32x32xf32>, vector<8x32xf32> -> vector<8x32xf32>
    %79 = arith.addf %77, %78 : vector<8x32xf32>
    %80 = math.tanh %79 : vector<8x32xf32>
    %c16_71 = arith.constant 16 : index
    %c0_72 = arith.constant 0 : index
    %81 = vector.load %arg14[%c16_71, %c0_72] : memref<64x32xf32, #tpu.memory_space<vmem>>, vector<8x32xf32>
    %cst_73 = arith.constant dense<0.000000e+00> : vector<8x32xf32>
    %82 = tpu.matmul %80, %63, %cst_73 {dimension_numbers = #tpu.dot_dimension_numbers<[1], [0], [0], [1], [0, 0, 1, 1], [], []>} : vector<8x32xf32>, vector<32x32xf32>, vector<8x32xf32> -> vector<8x32xf32>
    %83 = arith.addf %81, %82 : vector<8x32xf32>
    %84 = math.tanh %83 : vector<8x32xf32>
    %c24_74 = arith.constant 24 : index
    %c0_75 = arith.constant 0 : index
    %85 = vector.load %arg14[%c24_74, %c0_75] : memref<64x32xf32, #tpu.memory_space<vmem>>, vector<8x32xf32>
    %cst_76 = arith.constant dense<0.000000e+00> : vector<8x32xf32>
    %86 = tpu.matmul %84, %63, %cst_76 {dimension_numbers = #tpu.dot_dimension_numbers<[1], [0], [0], [1], [0, 0, 1, 1], [], []>} : vector<8x32xf32>, vector<32x32xf32>, vector<8x32xf32> -> vector<8x32xf32>
    %87 = arith.addf %85, %86 : vector<8x32xf32>
    %88 = math.tanh %87 : vector<8x32xf32>
    %c32_77 = arith.constant 32 : index
    %c0_78 = arith.constant 0 : index
    %89 = vector.load %arg14[%c32_77, %c0_78] : memref<64x32xf32, #tpu.memory_space<vmem>>, vector<8x32xf32>
    %cst_79 = arith.constant dense<0.000000e+00> : vector<8x32xf32>
    %90 = tpu.matmul %88, %63, %cst_79 {dimension_numbers = #tpu.dot_dimension_numbers<[1], [0], [0], [1], [0, 0, 1, 1], [], []>} : vector<8x32xf32>, vector<32x32xf32>, vector<8x32xf32> -> vector<8x32xf32>
    %91 = arith.addf %89, %90 : vector<8x32xf32>
    %92 = math.tanh %91 : vector<8x32xf32>
    %c40_80 = arith.constant 40 : index
    %c0_81 = arith.constant 0 : index
    %93 = vector.load %arg14[%c40_80, %c0_81] : memref<64x32xf32, #tpu.memory_space<vmem>>, vector<8x32xf32>
    %cst_82 = arith.constant dense<0.000000e+00> : vector<8x32xf32>
    %94 = tpu.matmul %92, %63, %cst_82 {dimension_numbers = #tpu.dot_dimension_numbers<[1], [0], [0], [1], [0, 0, 1, 1], [], []>} : vector<8x32xf32>, vector<32x32xf32>, vector<8x32xf32> -> vector<8x32xf32>
    %95 = arith.addf %93, %94 : vector<8x32xf32>
    %96 = math.tanh %95 : vector<8x32xf32>
    %c48_83 = arith.constant 48 : index
    %c0_84 = arith.constant 0 : index
    %97 = vector.load %arg14[%c48_83, %c0_84] : memref<64x32xf32, #tpu.memory_space<vmem>>, vector<8x32xf32>
    %cst_85 = arith.constant dense<0.000000e+00> : vector<8x32xf32>
    %98 = tpu.matmul %96, %63, %cst_85 {dimension_numbers = #tpu.dot_dimension_numbers<[1], [0], [0], [1], [0, 0, 1, 1], [], []>} : vector<8x32xf32>, vector<32x32xf32>, vector<8x32xf32> -> vector<8x32xf32>
    %99 = arith.addf %97, %98 : vector<8x32xf32>
    %100 = math.tanh %99 : vector<8x32xf32>
    %c56_86 = arith.constant 56 : index
    %c0_87 = arith.constant 0 : index
    %101 = vector.load %arg14[%c56_86, %c0_87] : memref<64x32xf32, #tpu.memory_space<vmem>>, vector<8x32xf32>
    %cst_88 = arith.constant dense<0.000000e+00> : vector<8x32xf32>
    %102 = tpu.matmul %100, %63, %cst_88 {dimension_numbers = #tpu.dot_dimension_numbers<[1], [0], [0], [1], [0, 0, 1, 1], [], []>} : vector<8x32xf32>, vector<32x32xf32>, vector<8x32xf32> -> vector<8x32xf32>
    %103 = arith.addf %101, %102 : vector<8x32xf32>
    %104 = math.tanh %103 : vector<8x32xf32>
    %c0_89 = arith.constant 0 : index
    %c0_90 = arith.constant 0 : index
    %105 = vector.load %arg11[%c0_89, %c0_90] : memref<32x1xf32, #tpu.memory_space<vmem>>, vector<32x1xf32>
    %cst_91 = arith.constant dense<0.000000e+00> : vector<8x1xf32>
    %106 = tpu.matmul %104, %105, %cst_91 {dimension_numbers = #tpu.dot_dimension_numbers<[1], [0], [0], [1], [0, 0, 1, 1], [], []>} : vector<8x32xf32>, vector<32x1xf32>, vector<8x1xf32> -> vector<8x1xf32>
    %c0_92 = arith.constant 0 : index
    %c0_93 = arith.constant 0 : index
    %107 = vector.load %arg12[%c0_92, %c0_93] : memref<1x1xf32, #tpu.memory_space<vmem>>, vector<1x1xf32>
    %108 = vector.broadcast %107 : vector<1x1xf32> to vector<8x1xf32>
    %109 = arith.addf %106, %108 : vector<8x1xf32>
    %110 = arith.negf %109 : vector<8x1xf32>
    %111 = math.exp %110 : vector<8x1xf32>
    %cst_94 = arith.constant 1.000000e+00 : f32
    %112 = vector.broadcast %cst_94 : f32 to vector<8x1xf32>
    %113 = arith.addf %112, %111 : vector<8x1xf32>
    %114 = arith.divf %112, %113 : vector<8x1xf32>
    %c0_95 = arith.constant 0 : index
    %c0_96 = arith.constant 0 : index
    %115 = vector.load %arg13[%c0_95, %c0_96] : memref<8x1xf32, #tpu.memory_space<vmem>>, vector<8x1xf32>
    tpu.vector_store %arg13[%c0_95, %c0_96], %114 {strides = array<i32>} : memref<8x1xf32, #tpu.memory_space<vmem>>, vector<8x1xf32>,
    return
  }
  func.func @transform_0(%arg0: i32) -> (i32, i32, i32) {
    %c0_i32 = arith.constant 0 : i32
    %c0_i32_0 = arith.constant 0 : i32
    %c0_i32_1 = arith.constant 0 : i32
    return %arg0, %c0_i32, %c0_i32_0 : i32, i32, i32
  }
  func.func @transform_1(%arg0: i32) -> (i32, i32) {
    %c0_i32 = arith.constant 0 : i32
    %c0_i32_0 = arith.constant 0 : i32
    %c0_i32_1 = arith.constant 0 : i32
    return %c0_i32, %c0_i32_0 : i32, i32
  }
  func.func @transform_2(%arg0: i32) -> (i32, i32) {
    %c0_i32 = arith.constant 0 : i32
    %c0_i32_0 = arith.constant 0 : i32
    %c0_i32_1 = arith.constant 0 : i32
    return %c0_i32, %c0_i32_0 : i32, i32
  }
  func.func @transform_3(%arg0: i32) -> (i32, i32) {
    %c0_i32 = arith.constant 0 : i32
    %c0_i32_0 = arith.constant 0 : i32
    %c0_i32_1 = arith.constant 0 : i32
    return %c0_i32, %c0_i32_0 : i32, i32
  }
  func.func @transform_4(%arg0: i32) -> (i32, i32) {
    %c0_i32 = arith.constant 0 : i32
    %c0_i32_0 = arith.constant 0 : i32
    %c0_i32_1 = arith.constant 0 : i32
    return %c0_i32, %c0_i32_0 : i32, i32
  }
  func.func @transform_5(%arg0: i32) -> (i32, i32) {
    %c0_i32 = arith.constant 0 : i32
    %c0_i32_0 = arith.constant 0 : i32
    %c0_i32_1 = arith.constant 0 : i32
    return %c0_i32, %c0_i32_0 : i32, i32
  }
  func.func @transform_6(%arg0: i32) -> (i32, i32) {
    %c0_i32 = arith.constant 0 : i32
    %c0_i32_0 = arith.constant 0 : i32
    %c0_i32_1 = arith.constant 0 : i32
    return %c0_i32, %c0_i32_0 : i32, i32
  }
  func.func @transform_7(%arg0: i32) -> (i32, i32) {
    %c0_i32 = arith.constant 0 : i32
    %c0_i32_0 = arith.constant 0 : i32
    %c0_i32_1 = arith.constant 0 : i32
    return %c0_i32, %c0_i32_0 : i32, i32
  }
  func.func @transform_8(%arg0: i32) -> (i32, i32) {
    %c0_i32 = arith.constant 0 : i32
    %c0_i32_0 = arith.constant 0 : i32
    %c0_i32_1 = arith.constant 0 : i32
    return %c0_i32, %c0_i32_0 : i32, i32
  }
  func.func @transform_9(%arg0: i32) -> (i32, i32) {
    %c0_i32 = arith.constant 0 : i32
    %c0_i32_0 = arith.constant 0 : i32
    %c0_i32_1 = arith.constant 0 : i32
    return %c0_i32, %c0_i32_0 : i32, i32
  }
  func.func @transform_10(%arg0: i32) -> (i32, i32) {
    %c0_i32 = arith.constant 0 : i32
    %c0_i32_0 = arith.constant 0 : i32
    %c0_i32_1 = arith.constant 0 : i32
    return %c0_i32, %c0_i32_0 : i32, i32
  }
  func.func @transform_11(%arg0: i32) -> (i32, i32) {
    %c0_i32 = arith.constant 0 : i32
    %c0_i32_0 = arith.constant 0 : i32
    %c0_i32_1 = arith.constant 0 : i32
    return %c0_i32, %c0_i32_0 : i32, i32
  }
  func.func @transform_12(%arg0: i32) -> (i32, i32) {
    %c0_i32 = arith.constant 0 : i32
    %c0_i32_0 = arith.constant 0 : i32
    return %arg0, %c0_i32 : i32, i32
  }
}

</mosaic_0001>

<bundles_post_ra>
// kernel: tpu_custom_call.1
= control target key start
LH: loop header
LB: loop body
LE: loop exit
PB: predicated region body
PF: predicated region fallthrough
CT: control target
= control target key end

     0   :  { %v44_v0 = vlaneseq  ;;  %vm156_vm0 = vcmask 1043456   ;;  %vm131_vm1 = vcmask 818176   ;;  %v943_v25 = vmov 0.0   ;;  %s1302_s1 = inlined_call_operand.vmem [shape: f32[100,32], index: 1, kind: input, shape index: {}]   ;;  %s1303_s0 = inlined_call_operand.vmem [shape: s32[1,8,8], index: 0, kind: input, shape index: {}]   ;;  %s1304_s2 = inlined_call_operand.vmem [shape: f32[32,32], index: 2, kind: input, shape index: {}]   ;;  %s1305_s3 = inlined_call_operand.vmem [shape: f32[32,32], index: 3, kind: input, shape index: {}]   ;;  %s1306_s4 = inlined_call_operand.vmem [shape: f32[1,32], index: 4, kind: input, shape index: {}]   ;;  %s1307_s5 = inlined_call_operand.vmem [shape: f32[1,32], index: 5, kind: input, shape index: {}]   ;;  %s1308_s6 = inlined_call_operand.vmem [shape: f32[32,32], index: 6, kind: input, shape index: {}]   ;;  %s1309_s7 = inlined_call_operand.vmem [shape: f32[32,32], index: 7, kind: input, shape index: {}]   ;;  %s1310_s8 = inlined_call_operand.vmem [shape: f32[1,32], index: 8, kind: input, shape index: {}]   ;;  %s1311_s9 = inlined_call_operand.vmem [shape: f32[1,32], index: 9, kind: input, shape index: {}]   ;;  %s1312_s10 = inlined_call_operand.vmem [shape: f32[32,1], index: 10, kind: input, shape index: {}]   ;;  %s1313_s11 = inlined_call_operand.<no memory space> [shape: f32[1,1], index: 11, kind: input, shape index: {}]   ;;  %s1314_s12 = inlined_call_operand.vmem [shape: f32[8,1], index: 12, kind: output, shape index: {}]  }
   0x1   :  { %v130_v1 = vld [vmem:[%s1302_s1 + $0x60] sm:$0xf]  ;;  %v129_v3 = vld [vmem:[%s1302_s1 + $0x58] sm:$0xff]  ;;  %v128_v4 = vld [vmem:[%s1302_s1 + $0x50] sm:$0xff]  ;;  %vm215_vm9 = vcmask 261120   ;;  %vm855_vm14 = vcmask 7168  }
   0x2   :  { %v48_v2 = vshrl.u32 %v44_v0, 7  ;;  %861 = vmatpush.msk.msra.mxu0 %vm156_vm0, %v130_v1  ;;  %v1021_v5 = vld [vmem:[%s1303_s0] sm:$0xff]  ;;  %v127_v6 = vld [vmem:[%s1302_s1 + $0x48] sm:$0xff]  ;;  %v125_v11 = vld [vmem:[%s1302_s1 + $0x38] sm:$0xff]  ;;  %v1060_v23 = vand.u32 127, %v44_v0 }
   0x3   :  { %v46_v7 = vperm.slane %v1021_v5, 0  ;;  %v60_v8 = vperm.slane %v1021_v5, 2  ;;  %v126_v9 = vld [vmem:[%s1302_s1 + $0x40] sm:$0xff]  ;;  %v74_v10 = vperm.slane %v1021_v5, 4  ;;  %v124_v12 = vld [vmem:[%s1302_s1 + $0x30] sm:$0xff]  ;;  %v123_v13 = vld [vmem:[%s1302_s1 + $0x28] sm:$0xff] }
   0x4   :  { %903 = vset.pattern.permute.xlu0 %v48_v2  ;;  %904 = vset.pattern.permute.xlu1 %v48_v2  ;;  %v53_v14 = vperm.slane %v1021_v5, 1  ;;  %v67_v15 = vperm.slane %v1021_v5, 3  ;;  %v122_v16 = vld [vmem:[%s1302_s1 + $0x20] sm:$0xff]  ;;  %v81_v17 = vperm.slane %v1021_v5, 5  ;;  %v121_v18 = vld [vmem:[%s1302_s1 + $0x18] sm:$0xff]  ;;  %v120_v19 = vld [vmem:[%s1302_s1 + $0x10] sm:$0xff] }
   0x5   :  { %905 = vset.pattern.permute.xlu2 %v48_v2  ;;  %164 = vmatpush.msra.mxu0 %v129_v3  ;;  %v119_v20 = vld [vmem:[%s1302_s1 + $0x8] sm:$0xff]  ;;  %v88_v21 = vperm.slane %v1021_v5, 6  ;;  %v118_v22 = vld [vmem:[%s1302_s1] sm:$0xff]  ;;  %v204_v32 = vld [vmem:[%s1304_s2 + $0x18] sm:$0xff]  ;;  %v95_v48 = vperm.slane %v1021_v5, 7 }
   0x6   :  { %v203_v33 = vld [vmem:[%s1304_s2 + $0x10] sm:$0xff]  ;;  %252 = vmatpush.msra.mxu1 %v204_v32  ;;  %v1080_v34 = vld [vmem:[%s1305_s3 + $0x18] sm:$0xff]  ;;  %v202_v35 = vld [vmem:[%s1304_s2 + $0x8] sm:$0xff] }
   0x7   :  { %165 = vmatpush.msra.mxu0 %v128_v4  ;;  %305 = vmatpush.msra.mxu3 %v1080_v34  ;;  %v201_v43 = vld [vmem:[%s1304_s2] sm:$0xff]  ;;  %v1105_v44 = vld [vmem:[%s1305_s3 + $0x10] sm:$0xff]  ;;  %v1111_v45 = vld [vmem:[%s1305_s3 + $0x8] sm:$0xff] }
   0x8   :  { %359 = vmatpush.msra.mxu2 %v1080_v34  ;;  %253 = vmatpush.msra.mxu1 %v203_v33  ;;  %v1116_v46 = vld [vmem:[%s1305_s3] sm:$0xff] }
   0x9   :  { %166 = vmatpush.msra.mxu0 %v127_v6  ;;  %306 = vmatpush.msra.mxu3 %v1105_v44  ;;  %v209_v55 = vld [vmem:[%s1306_s4] sm:$0x1] }
   0xa   :  { %254 = vmatpush.msra.mxu1 %v202_v35  ;;  %360 = vmatpush.msra.mxu2 %v1105_v44  ;;  %v210_v56 = vld [vmem:[%s1307_s5] sm:$0x1]  ;;  %v508_v35 = vld [vmem:[%s1308_s6 + $0x18] sm:$0xff] }
   0xb   :  { %167 = vmatpush.msra.mxu0 %v126_v9  ;;  %307 = vmatpush.msra.mxu3 %v1111_v45  ;;  %v211_v57 = vadd.f32 %v210_v56, %v209_v55 }
   0xc   :  { %51 = vperm.xlu0 %903, %v46_v7   ;;  %65 = vperm.xlu1 %904, %v60_v8  }
   0xd   :  { %79 = vperm.xlu2 %905, %v74_v10   ;;  %168 = vmatpush.msra.mxu0 %v125_v11  ;;  %v213_v59 = vperm.slane %v211_v57, 0 }
   0xe   :  { %255 = vmatpush.msra.mxu1 %v201_v43  ;;  %361 = vmatpush.msra.mxu2 %v1111_v45 }
   0xf   :  { %169 = vmatpush.msra.mxu0 %v124_v12  ;;  %308 = vmatpush.msra.mxu3 %v1116_v46 }
  0x10   :  { %309 = vmatmul.f32.vlgmr.msra.gmra.mxu3 %v943_v25  ;;  %362 = vmatpush.msra.mxu2 %v1116_v46 }
  0x11   :  { %170 = vmatpush.msra.mxu0 %v123_v13  ;;  %332 = vmatpush.msrb.mxu3 %v1080_v34 }
  0x12   :  { %413 = vmatpush.msrb.mxu2 %v1080_v34 }
  0x13   :  { %171 = vmatpush.msra.mxu0 %v122_v16  ;;  %333 = vmatpush.msrb.mxu3 %v1105_v44 }
  0x14   :  { %58 = vperm.xlu0 %903, %v53_v14   ;;  %72 = vperm.xlu1 %904, %v67_v15  }
  0x15   :  { %86 = vperm.xlu2 %905, %v81_v17   ;;  %172 = vmatpush.msra.mxu0 %v121_v18 }
  0x16   :  { %414 = vmatpush.msrb.mxu2 %v1105_v44  ;;  %334 = vmatpush.msrb.mxu3 %v1111_v45 }
  0x17   :  { %173 = vmatpush.msra.mxu0 %v120_v19 }
  0x18   :  { %415 = vmatpush.msrb.mxu2 %v1111_v45  ;;  %335 = vmatpush.msrb.mxu3 %v1116_v46 }
  0x19   :  { %174 = vmatpush.msra.mxu0 %v119_v20 }
  0x1a   :  { %416 = vmatpush.msrb.mxu2 %v1116_v46  ;;  %386 = vmatpush.msra.mxu3 %v1080_v34 }
  0x1b   :  { %175 = vmatpush.msra.mxu0 %v118_v22 }
  0x1c   :  { %93 = vperm.xlu0 %903, %v88_v21   ;;  %387 = vmatpush.msra.mxu3 %v1105_v44 }
  0x1d   :  { %100 = vperm.xlu1 %904, %v95_v48  }
  0x1e   :  { %388 = vmatpush.msra.mxu3 %v1111_v45 }
  0x20   :  { %389 = vmatpush.msra.mxu3 %v1116_v46 }
  0x67   :  { %v80_v37 = vpop.permute.xlu2 %79 }
  0x68   :  { %vm106_vm6 = vcmp.eq.s32.totalorder %v1060_v23, %v80_v37  ;;  %v506_v37 = vld [vmem:[%s1308_s6 + $0x8] sm:$0xff] }
  0x69   :  { %v114_v38 = vsel %vm106_vm6, 1.0, %v943_v25 }
  0x6f   :  { %v87_v39 = vpop.permute.xlu2 %86 }
  0x70   :  { %vm107_vm7 = vcmp.eq.s32.totalorder %v1060_v23, %v87_v39 }
  0x71   :  { %v115_v40 = vsel %vm107_vm7, 1.0, %v943_v25 }
  0x7e   :  { %v52_v24 = vpop.permute.xlu0 %51  ;;  %v66_v28 = vpop.permute.xlu1 %65 }
  0x7f   :  { %vm102_vm2 = vcmp.eq.s32.totalorder %v1060_v23, %v52_v24  ;;  %vm104_vm4 = vcmp.eq.s32.totalorder %v1060_v23, %v66_v28 }
  0x80   :  { %v110_v26 = vsel %vm102_vm2, 1.0, %v943_v25  ;;  %v112_v30 = vsel %vm104_vm4, 1.0, %v943_v25 }
  0x81   :  { %862 = vmatmul.msk.f32.vlgmr.msra.gmra.mxu0 %vm131_vm1, %v110_v26 }
  0x86   :  { %v59_v27 = vpop.permute.xlu0 %58  ;;  %v73_v31 = vpop.permute.xlu1 %72 }
  0x87   :  { %vm103_vm3 = vcmp.eq.s32.totalorder %v1060_v23, %v59_v27  ;;  %vm105_vm5 = vcmp.eq.s32.totalorder %v1060_v23, %v73_v31 }
  0x88   :  { %v111_v29 = vsel %vm103_vm3, 1.0, %v943_v25  ;;  %v113_v36 = vsel %vm105_vm5, 1.0, %v943_v25 }
  0x89   :  { %863 = vmatmul.msk.f32.gmra.mxu0 %vm131_vm1, %v111_v29 }
  0x8e   :  { %v94_v41 = vpop.permute.xlu0 %93 }
  0x8f   :  { %vm108_vm8 = vcmp.eq.s32.totalorder %v1060_v23, %v94_v41  ;;  %v101_v58 = vpop.permute.xlu1 %100 }
  0x90   :  { %v116_v42 = vsel %vm108_vm8, 1.0, %v943_v25  ;;  %vm109_vm10 = vcmp.eq.s32.totalorder %v1060_v23, %v101_v58 }
  0x91   :  { %864 = vmatmul.msk.f32.gmra.mxu0 %vm131_vm1, %v112_v30  ;;  %v117_v60 = vsel %vm109_vm10, 1.0, %v943_v25 }
  0x93   :  { %v310_v0 = vpop.f32.mrf.mxu3 }
  0x99   :  { %865 = vmatmul.msk.f32.gmra.mxu0 %vm131_vm1, %v113_v36  ;;  %v507_v36 = vld [vmem:[%s1308_s6 + $0x10] sm:$0xff] }
  0xa1   :  { %866 = vmatmul.msk.f32.gmra.mxu0 %vm131_vm1, %v114_v38  ;;  %v505_v38 = vld [vmem:[%s1308_s6] sm:$0xff] }
  0xa9   :  { %867 = vmatmul.msk.f32.gmra.mxu0 %vm131_vm1, %v115_v40 }
  0xb1   :  { %868 = vmatmul.msk.f32.gmra.mxu0 %vm131_vm1, %v116_v42 }
  0xb9   :  { %869 = vmatmul.msk.f32.gmra.mxu0 %vm131_vm1, %v117_v60 }
  0xfe   :  { %v177_v47 = vpop.f32.mrf.mxu0 }
  0xff   :  { %870 = vmatmul.msk.f32.vlgmr.msra.gmra.mxu1 %vm215_vm9, %v177_v47 }
 0x106   :  { %v180_v49 = vpop.f32.mrf.mxu0 }
 0x107   :  { %871 = vmatmul.msk.f32.gmra.mxu1 %vm215_vm9, %v180_v49  ;;  %v1207_v49 = vld [vmem:[%s1309_s7 + $0x18] sm:$0xff] }
 0x108   :  { %717 = vmatpush.msrb.mxu1 %v1207_v49 }
 0x10e   :  { %v183_v50 = vpop.f32.mrf.mxu0 }
 0x10f   :  { %872 = vmatmul.msk.f32.gmra.mxu1 %vm215_vm9, %v183_v50  ;;  %v1213_v50 = vld [vmem:[%s1309_s7 + $0x10] sm:$0xff] }
 0x110   :  { %718 = vmatpush.msrb.mxu1 %v1213_v50 }
 0x116   :  { %v186_v51 = vpop.f32.mrf.mxu0 }
 0x117   :  { %873 = vmatmul.msk.f32.gmra.mxu1 %vm215_vm9, %v186_v51  ;;  %v1219_v51 = vld [vmem:[%s1309_s7 + $0x8] sm:$0xff] }
 0x118   :  { %719 = vmatpush.msrb.mxu1 %v1219_v51 }
 0x11e   :  { %v189_v52 = vpop.f32.mrf.mxu0 }
 0x11f   :  { %874 = vmatmul.msk.f32.gmra.mxu1 %vm215_vm9, %v189_v52  ;;  %v1228_v52 = vld [vmem:[%s1309_s7] sm:$0xff] }
 0x120   :  { %720 = vmatpush.msrb.mxu1 %v1228_v52 }
 0x122   :  { %769 = vmatpush.msra.mxu1 %v1207_v49 }
 0x124   :  { %770 = vmatpush.msra.mxu1 %v1213_v50 }
 0x126   :  { %v192_v53 = vpop.f32.mrf.mxu0  ;;  %771 = vmatpush.msra.mxu1 %v1219_v51 }
 0x127   :  { %875 = vmatmul.msk.f32.gmra.mxu1 %vm215_vm9, %v192_v53  ;;  %v513_v53 = vld [vmem:[%s1310_s8] sm:$0x1] }
 0x128   :  { %772 = vmatpush.msra.mxu1 %v1228_v52 }
 0x12e   :  { %v195_v54 = vpop.f32.mrf.mxu0 }
 0x12f   :  { %876 = vmatmul.msk.f32.gmra.mxu1 %vm215_vm9, %v195_v54  ;;  %v514_v54 = vld [vmem:[%s1311_s9] sm:$0x1] }
 0x130   :  { %v515_v58 = vadd.f32 %v514_v54, %v513_v53 }
 0x136   :  { %v198_v15 = vpop.f32.mrf.mxu0 }
 0x137   :  { %877 = vmatmul.msk.f32.gmra.mxu1 %vm215_vm9, %v198_v15 }
 0x17c   :  { %v257_v61 = vpop.f32.mrf.mxu1 }
 0x17d   :  { %v258_v62 = vadd.f32 %v257_v61, %v213_v59 }
 0x17f   :  { %281 = vst.msk [vmem:[#allocation2] sm:$0xff] %vm215_vm9, %v258_v62 }
 0x184   :  { %v260_v63 = vpop.f32.mrf.mxu1 }
 0x185   :  { %v261_v1 = vadd.f32 %v260_v63, %v213_v59 }
 0x186   :  { %v289_v2 = vld [vmem:[#allocation2] sm:$0xff] }
 0x187   :  { %282 = vst.msk [vmem:[#allocation2 + $0x8] sm:$0xff] %vm215_vm9, %v261_v1  ;;  %v313_v3 = vadd.f32 %v310_v0, %v289_v2 }
 0x189   :  { %907 = vtanh.f32 %v313_v3 }
 0x18c   :  { %v263_v4 = vpop.f32.mrf.mxu1 }
 0x18d   :  { %v264_v5 = vadd.f32 %v263_v4, %v213_v59 }
 0x18e   :  { %v316_v16 = vld [vmem:[#allocation2 + $0x8] sm:$0xff] }
 0x18f   :  { %v908_v6 = vpop.eup %907  ;;  %283 = vst.msk [vmem:[#allocation2 + $0x10] sm:$0xff] %vm215_vm9, %v264_v5 }
 0x190   :  { %315 = vst.msk [vmem:[#allocation2] sm:$0xff] %vm215_vm9, %v908_v6  ;;  %878 = vmatmul.msk.f32.vlgmr.msrb.gmra.mxu3 %vm215_vm9, %v908_v6 }
 0x191   :  { %440 = vmatpush.msrb.mxu3 %v1080_v34 }
 0x193   :  { %441 = vmatpush.msrb.mxu3 %v1105_v44 }
 0x194   :  { %v266_v7 = vpop.f32.mrf.mxu1 }
 0x195   :  { %v267_v8 = vadd.f32 %v266_v7, %v213_v59  ;;  %442 = vmatpush.msrb.mxu3 %v1111_v45 }
 0x196   :  { %v343_v22 = vld [vmem:[#allocation2 + $0x10] sm:$0xff] }
 0x197   :  { %284 = vst.msk [vmem:[#allocation2 + $0x18] sm:$0xff] %vm215_vm9, %v267_v8  ;;  %443 = vmatpush.msrb.mxu3 %v1116_v46  ;;  %v516_v43 = vld [vmem:[#allocation2] sm:$0xff] }
 0x19c   :  { %v269_v9 = vpop.f32.mrf.mxu1 }
 0x19d   :  { %v270_v10 = vadd.f32 %v269_v9, %v213_v59 }
 0x19e   :  { %v370_v27 = vld [vmem:[#allocation2 + $0x18] sm:$0xff] }
 0x19f   :  { %285 = vst.msk [vmem:[#allocation2 + $0x20] sm:$0xff] %vm215_vm9, %v270_v10 }
 0x1a4   :  { %v272_v11 = vpop.f32.mrf.mxu1 }
 0x1a5   :  { %v273_v12 = vadd.f32 %v272_v11, %v213_v59 }
 0x1a6   :  { %v397_v31 = vld [vmem:[#allocation2 + $0x20] sm:$0xff] }
 0x1a7   :  { %286 = vst.msk [vmem:[#allocation2 + $0x28] sm:$0xff] %vm215_vm9, %v273_v12 }
 0x1ac   :  { %v275_v13 = vpop.f32.mrf.mxu1 }
 0x1ad   :  { %v276_v14 = vadd.f32 %v275_v13, %v213_v59 }
 0x1ae   :  { %v424_v39 = vld [vmem:[#allocation2 + $0x28] sm:$0xff] }
 0x1af   :  { %287 = vst.msk [vmem:[#allocation2 + $0x30] sm:$0xff] %vm215_vm9, %v276_v14 }
 0x1b4   :  { %v278_v20 = vpop.f32.mrf.mxu1 }
 0x1b5   :  { %v279_v21 = vadd.f32 %v278_v20, %v213_v59  ;;  %v525_v59 = vperm.slane %v515_v58, 0 }
 0x1b6   :  { %v451_v55 = vld [vmem:[#allocation2 + $0x30] sm:$0xff] }
 0x1b7   :  { %288 = vst.msk [vmem:[#allocation2 + $0x38] sm:$0xff] %vm215_vm9, %v279_v21 }
 0x1be   :  { %v478_v9 = vld [vmem:[#allocation2 + $0x38] sm:$0xff] }
 0x213   :  { %v337_v17 = vpop.f32.mrf.mxu3 }
 0x214   :  { %v340_v18 = vadd.f32 %v337_v17, %v316_v16 }
 0x216   :  { %909 = vtanh.f32 %v340_v18 }
 0x21c   :  { %v910_v19 = vpop.eup %909 }
 0x21d   :  { %342 = vst.msk [vmem:[#allocation2 + $0x8] sm:$0xff] %vm215_vm9, %v910_v19  ;;  %879 = vmatmul.msk.f32.vlgmr.msra.gmra.mxu2 %vm215_vm9, %v910_v19 }
 0x21e   :  { %467 = vmatpush.msra.mxu2 %v1080_v34 }
 0x220   :  { %468 = vmatpush.msra.mxu2 %v1105_v44 }
 0x222   :  { %469 = vmatpush.msra.mxu2 %v1111_v45 }
 0x224   :  { %470 = vmatpush.msra.mxu2 %v1116_v46 }
 0x2a0   :  { %v364_v23 = vpop.f32.mrf.mxu2 }
 0x2a1   :  { %v367_v24 = vadd.f32 %v364_v23, %v343_v22 }
 0x2a3   :  { %911 = vtanh.f32 %v367_v24 }
 0x2a9   :  { %v912_v26 = vpop.eup %911 }
 0x2aa   :  { %369 = vst.msk [vmem:[#allocation2 + $0x10] sm:$0xff] %vm215_vm9, %v912_v26  ;;  %880 = vmatmul.msk.f32.vlgmr.msra.gmra.mxu3 %vm215_vm9, %v912_v26 }
 0x2ab   :  { %494 = vmatpush.msra.mxu3 %v1080_v34 }
 0x2ad   :  { %495 = vmatpush.msra.mxu3 %v1105_v44  ;;  %v517_v44 = vld [vmem:[#allocation2 + $0x8] sm:$0xff] }
 0x2af   :  { %496 = vmatpush.msra.mxu3 %v1111_v45 }
 0x2b1   :  { %497 = vmatpush.msra.mxu3 %v1116_v46  ;;  %v518_v45 = vld [vmem:[#allocation2 + $0x10] sm:$0xff] }
 0x32d   :  { %v391_v28 = vpop.f32.mrf.mxu3 }
 0x32e   :  { %v394_v29 = vadd.f32 %v391_v28, %v370_v27 }
 0x330   :  { %913 = vtanh.f32 %v394_v29 }
 0x336   :  { %v914_v30 = vpop.eup %913 }
 0x337   :  { %396 = vst.msk [vmem:[#allocation2 + $0x18] sm:$0xff] %vm215_vm9, %v914_v30  ;;  %881 = vmatmul.msk.f32.vlgmr.msrb.gmra.mxu2 %vm215_vm9, %v914_v30 }
 0x338   :  { %563 = vmatpush.msrb.mxu2 %v508_v35 }
 0x33a   :  { %564 = vmatpush.msrb.mxu2 %v507_v36 }
 0x33c   :  { %565 = vmatpush.msrb.mxu2 %v506_v37 }
 0x33e   :  { %566 = vmatpush.msrb.mxu2 %v505_v38  ;;  %v519_v46 = vld [vmem:[#allocation2 + $0x18] sm:$0xff] }
 0x3ba   :  { %v418_v32 = vpop.f32.mrf.mxu2 }
 0x3bb   :  { %v421_v33 = vadd.f32 %v418_v32, %v397_v31 }
 0x3bd   :  { %915 = vtanh.f32 %v421_v33 }
 0x3c3   :  { %v916_v34 = vpop.eup %915 }
 0x3c4   :  { %423 = vst.msk [vmem:[#allocation2 + $0x20] sm:$0xff] %vm215_vm9, %v916_v34  ;;  %882 = vmatmul.msk.f32.vlgmr.msrb.gmra.mxu3 %vm215_vm9, %v916_v34 }
 0x3c5   :  { %613 = vmatpush.msrb.mxu3 %v1207_v49 }
 0x3c7   :  { %614 = vmatpush.msrb.mxu3 %v1213_v50 }
 0x3c9   :  { %615 = vmatpush.msrb.mxu3 %v1219_v51 }
 0x3cb   :  { %v520_v47 = vld [vmem:[#allocation2 + $0x20] sm:$0xff]  ;;  %616 = vmatpush.msrb.mxu3 %v1228_v52 }
 0x447   :  { %v445_v40 = vpop.f32.mrf.mxu3 }
 0x448   :  { %v448_v41 = vadd.f32 %v445_v40, %v424_v39 }
 0x44a   :  { %917 = vtanh.f32 %v448_v41 }
 0x450   :  { %v918_v42 = vpop.eup %917 }
 0x451   :  { %450 = vst.msk [vmem:[#allocation2 + $0x28] sm:$0xff] %vm215_vm9, %v918_v42  ;;  %883 = vmatmul.msk.f32.vlgmr.msra.gmra.mxu2 %vm215_vm9, %v918_v42 }
 0x458   :  { %v521_v48 = vld [vmem:[#allocation2 + $0x28] sm:$0xff] }
 0x459   :  { %885 = vmatmul.msk.f32.vlgmr.msrb.gmra.mxu2 %vm215_vm9, %v516_v43 }
 0x461   :  { %886 = vmatmul.msk.f32.gmra.mxu2 %vm215_vm9, %v517_v44 }
 0x469   :  { %887 = vmatmul.msk.f32.gmra.mxu2 %vm215_vm9, %v518_v45 }
 0x471   :  { %888 = vmatmul.msk.f32.gmra.mxu2 %vm215_vm9, %v519_v46 }
 0x479   :  { %889 = vmatmul.msk.f32.gmra.mxu2 %vm215_vm9, %v520_v47  ;;  %v808_v47 = vld [vmem:[%s1312_s10 + $0x18] sm:$0xff] }
 0x481   :  { %890 = vmatmul.msk.f32.gmra.mxu2 %vm215_vm9, %v521_v48  ;;  %v807_v48 = vld [vmem:[%s1312_s10 + $0x10] sm:$0xff] }
 0x4d4   :  { %v472_v56 = vpop.f32.mrf.mxu2 }
 0x4d5   :  { %v475_v57 = vadd.f32 %v472_v56, %v451_v55 }
 0x4d7   :  { %919 = vtanh.f32 %v475_v57 }
 0x4dc   :  { %v568_v60 = vpop.f32.mrf.mxu2 }
 0x4dd   :  { %v920_v61 = vpop.eup %919  ;;  %v569_v62 = vadd.f32 %v568_v60, %v525_v59 }
 0x4de   :  { %477 = vst.msk [vmem:[#allocation2 + $0x30] sm:$0xff] %vm215_vm9, %v920_v61  ;;  %884 = vmatmul.msk.f32.vlgmr.msra.gmra.mxu3 %vm215_vm9, %v920_v61 }
 0x4df   :  { %592 = vst.msk [vmem:[#allocation2] sm:$0xff] %vm215_vm9, %v569_v62  ;;  %639 = vmatpush.msra.mxu3 %v1207_v49 }
 0x4e1   :  { %640 = vmatpush.msra.mxu3 %v1213_v50 }
 0x4e3   :  { %641 = vmatpush.msra.mxu3 %v1219_v51 }
 0x4e4   :  { %v571_v63 = vpop.f32.mrf.mxu2 }
 0x4e5   :  { %v572_v0 = vadd.f32 %v571_v63, %v525_v59  ;;  %v522_v1 = vld [vmem:[#allocation2 + $0x30] sm:$0xff]  ;;  %642 = vmatpush.msra.mxu3 %v1228_v52 }
 0x4e6   :  { %891 = vmatmul.msk.f32.gmra.mxu2 %vm215_vm9, %v522_v1  ;;  %617 = vmatmul.f32.vlgmr.msrb.gmra.mxu3 %v943_v25  ;;  %v600_v13 = vld [vmem:[#allocation2] sm:$0xff] }
 0x4e7   :  { %593 = vst.msk [vmem:[#allocation2 + $0x8] sm:$0xff] %vm215_vm9, %v572_v0  ;;  %665 = vmatpush.msrb.mxu3 %v1207_v49 }
 0x4e9   :  { %666 = vmatpush.msrb.mxu3 %v1213_v50 }
 0x4eb   :  { %667 = vmatpush.msrb.mxu3 %v1219_v51 }
 0x4ec   :  { %v574_v2 = vpop.f32.mrf.mxu2 }
 0x4ed   :  { %v575_v3 = vadd.f32 %v574_v2, %v525_v59  ;;  %668 = vmatpush.msrb.mxu3 %v1228_v52 }
 0x4ee   :  { %v623_v21 = vld [vmem:[#allocation2 + $0x8] sm:$0xff] }
 0x4ef   :  { %594 = vst.msk [vmem:[#allocation2 + $0x10] sm:$0xff] %vm215_vm9, %v575_v3 }
 0x4f4   :  { %v577_v4 = vpop.f32.mrf.mxu2 }
 0x4f5   :  { %v578_v5 = vadd.f32 %v577_v4, %v525_v59 }
 0x4f6   :  { %v649_v27 = vld [vmem:[#allocation2 + $0x10] sm:$0xff] }
 0x4f7   :  { %595 = vst.msk [vmem:[#allocation2 + $0x18] sm:$0xff] %vm215_vm9, %v578_v5 }
 0x4fc   :  { %v580_v6 = vpop.f32.mrf.mxu2 }
 0x4fd   :  { %v581_v25 = vadd.f32 %v580_v6, %v525_v59 }
 0x4fe   :  { %v675_v31 = vld [vmem:[#allocation2 + $0x18] sm:$0xff] }
 0x4ff   :  { %596 = vst.msk [vmem:[#allocation2 + $0x20] sm:$0xff] %vm215_vm9, %v581_v25 }
 0x504   :  { %v583_v7 = vpop.f32.mrf.mxu2 }
 0x505   :  { %v584_v8 = vadd.f32 %v583_v7, %v525_v59 }
 0x506   :  { %v701_v35 = vld [vmem:[#allocation2 + $0x20] sm:$0xff] }
 0x507   :  { %597 = vst.msk [vmem:[#allocation2 + $0x28] sm:$0xff] %vm215_vm9, %v584_v8 }
 0x50e   :  { %v727_v39 = vld [vmem:[#allocation2 + $0x28] sm:$0xff] }
 0x561   :  { %v499_v10 = vpop.f32.mrf.mxu3 }
 0x562   :  { %v502_v11 = vadd.f32 %v499_v10, %v478_v9 }
 0x564   :  { %921 = vtanh.f32 %v502_v11 }
 0x569   :  { %v586_v12 = vpop.f32.mrf.mxu2  ;;  %v618_v14 = vpop.f32.mrf.mxu3 }
 0x56a   :  { %v922_v15 = vpop.eup %921  ;;  %v587_v16 = vadd.f32 %v586_v12, %v525_v59  ;;  %v621_v17 = vadd.f32 %v618_v14, %v600_v13 }
 0x56b   :  { %504 = vst.msk [vmem:[#allocation2 + $0x38] sm:$0xff] %vm215_vm9, %v922_v15 }
 0x56c   :  { %598 = vst.msk [vmem:[#allocation2 + $0x30] sm:$0xff] %vm215_vm9, %v587_v16  ;;  %923 = vtanh.f32 %v621_v17 }
 0x572   :  { %v924_v18 = vpop.eup %923  ;;  %v523_v19 = vld [vmem:[#allocation2 + $0x38] sm:$0xff] }
 0x573   :  { %892 = vmatmul.msk.f32.gmra.mxu2 %vm215_vm9, %v523_v19  ;;  %893 = vmatmul.msk.f32.vlgmr.msra.gmra.mxu3 %vm215_vm9, %v924_v18  ;;  %v753_v43 = vld [vmem:[#allocation2 + $0x30] sm:$0xff] }
 0x574   :  { %691 = vmatpush.msra.mxu3 %v1207_v49 }
 0x576   :  { %692 = vmatpush.msra.mxu3 %v1213_v50 }
 0x578   :  { %693 = vmatpush.msra.mxu3 %v1219_v51 }
 0x57a   :  { %694 = vmatpush.msra.mxu3 %v1228_v52 }
 0x5f6   :  { %v589_v20 = vpop.f32.mrf.mxu2  ;;  %v644_v22 = vpop.f32.mrf.mxu3 }
 0x5f7   :  { %v590_v23 = vadd.f32 %v589_v20, %v525_v59  ;;  %v647_v24 = vadd.f32 %v644_v22, %v623_v21 }
 0x5f9   :  { %599 = vst.msk [vmem:[#allocation2 + $0x38] sm:$0xff] %vm215_vm9, %v590_v23  ;;  %925 = vtanh.f32 %v647_v24 }
 0x5ff   :  { %v926_v26 = vpop.eup %925 }
 0x600   :  { %894 = vmatmul.msk.f32.vlgmr.msrb.gmra.mxu3 %vm215_vm9, %v926_v26 }
 0x601   :  { %743 = vmatpush.msrb.mxu3 %v1207_v49 }
 0x603   :  { %744 = vmatpush.msrb.mxu3 %v1213_v50 }
 0x605   :  { %745 = vmatpush.msrb.mxu3 %v1219_v51 }
 0x607   :  { %746 = vmatpush.msrb.mxu3 %v1228_v52 }
 0x683   :  { %v670_v28 = vpop.f32.mrf.mxu3 }
 0x684   :  { %v673_v29 = vadd.f32 %v670_v28, %v649_v27 }
 0x686   :  { %927 = vtanh.f32 %v673_v29 }
 0x68c   :  { %v928_v30 = vpop.eup %927 }
 0x68d   :  { %895 = vmatmul.msk.f32.vlgmr.msra.gmra.mxu3 %vm215_vm9, %v928_v30 }
 0x68e   :  { %795 = vmatpush.msra.mxu3 %v1207_v49  ;;  %v806_v49 = vld [vmem:[%s1312_s10 + $0x8] sm:$0xff] }
 0x690   :  { %796 = vmatpush.msra.mxu3 %v1213_v50  ;;  %v805_v50 = vld [vmem:[%s1312_s10] sm:$0xff] }
 0x692   :  { %797 = vmatpush.msra.mxu3 %v1219_v51  ;;  %v17_v51 = vstv %s1313_s11 }
 0x693   :  { %18 = vst [vmem:[#allocation3] sm:$0x1] %v17_v51 }
 0x694   :  { %798 = vmatpush.msra.mxu3 %v1228_v52  ;;  %v779_v52 = vld [vmem:[#allocation2 + $0x38] sm:$0xff] }
 0x69a   :  { %v906_v56 = vld [vmem:[#allocation3] ss:$0 sm:$0xff] }
 0x710   :  { %v696_v32 = vpop.f32.mrf.mxu3 }
 0x711   :  { %v699_v33 = vadd.f32 %v696_v32, %v675_v31 }
 0x713   :  { %929 = vtanh.f32 %v699_v33 }
 0x719   :  { %v930_v34 = vpop.eup %929 }
 0x71a   :  { %896 = vmatmul.msk.f32.vlgmr.msrb.gmra.mxu1 %vm215_vm9, %v930_v34 }
 0x71b   :  { %828 = vmatpush.msrb.mxu1 %v808_v47 }
 0x71d   :  { %829 = vmatpush.msrb.mxu1 %v807_v48 }
 0x71f   :  { %830 = vmatpush.msrb.mxu1 %v806_v49 }
 0x721   :  { %831 = vmatpush.msrb.mxu1 %v805_v50 }
 0x797   :  { %v722_v36 = vpop.f32.mrf.mxu1 }
 0x798   :  { %v725_v37 = vadd.f32 %v722_v36, %v701_v35 }
 0x79a   :  { %931 = vtanh.f32 %v725_v37 }
 0x7a0   :  { %v932_v38 = vpop.eup %931 }
 0x7a1   :  { %897 = vmatmul.msk.f32.vlgmr.msrb.gmra.mxu3 %vm215_vm9, %v932_v38 }
 0x824   :  { %v748_v40 = vpop.f32.mrf.mxu3 }
 0x825   :  { %v751_v41 = vadd.f32 %v748_v40, %v727_v39 }
 0x827   :  { %933 = vtanh.f32 %v751_v41 }
 0x82d   :  { %v934_v42 = vpop.eup %933 }
 0x82e   :  { %898 = vmatmul.msk.f32.vlgmr.msra.gmra.mxu1 %vm215_vm9, %v934_v42 }
 0x8ab   :  { %v774_v44 = vpop.f32.mrf.mxu1 }
 0x8ac   :  { %v777_v45 = vadd.f32 %v774_v44, %v753_v43 }
 0x8ae   :  { %935 = vtanh.f32 %v777_v45 }
 0x8b4   :  { %v936_v46 = vpop.eup %935 }
 0x8b5   :  { %899 = vmatmul.msk.f32.vlgmr.msra.gmra.mxu3 %vm215_vm9, %v936_v46 }
 0x938   :  { %v800_v53 = vpop.f32.mrf.mxu3 }
 0x939   :  { %v803_v54 = vadd.f32 %v800_v53, %v779_v52 }
 0x93b   :  { %937 = vtanh.f32 %v803_v54 }
 0x941   :  { %v938_v55 = vpop.eup %937 }
 0x942   :  { %900 = vmatmul.msk.f32.vlgmr.msrb.gmra.mxu1 %vm215_vm9, %v938_v55 }
 0x9bf   :  { %v833_v57 = vpop.f32.mrf.mxu1 }
 0x9c0   :  { %v834_v58 = vadd.f32 %v906_v56, %v833_v57 }
 0x9c2   :  { %v901_v59 = vmul.f32 -1.442695, %v834_v58 }
 0x9c4   :  { %939 = vpow2.f32 %v901_v59 }
 0x9ca   :  { %v940_v60 = vpop.eup %939 }
 0x9cb   :  { %v839_v61 = vadd.f32 1.0, %v940_v60 }
 0x9cd   :  { %941 = vrcp.f32 %v839_v61  ;;  %v851_v1 = vand.u32 2147483648, %v839_v61  ;;  %v849_v3 = vand.u32 2147483647, %v839_v61  ;;  %vm845_vm12 = vweird.f32 %v839_v61 }
 0x9cf   :  { %v852_v5 = vor.u32 1.1754944e-38, %v851_v1  ;;  %vm850_vm15 = vcmp.eq.f32.partialorder %v849_v3, 8.507059e+37 }
 0x9d3   :  { %v942_v62 = vpop.eup %941 }
 0x9d4   :  { %v841_v63 = vmul.f32 %v942_v62, %v839_v61  ;;  %vm846_vm11 = vweird.f32 %v942_v62 }
 0x9d5   :  { %vm847_vm13 = vmor %vm845_vm12, %vm846_vm11 }
 0x9d6   :  { %v842_v0 = vsub.f32 1.0, %v841_v63 }
 0x9d8   :  { %v843_v2 = vmul.f32 %v942_v62, %v842_v0 }
 0x9da   :  { %v844_v4 = vadd.f32 %v942_v62, %v843_v2 }
 0x9dc   :  { %v848_v6 = vsel %vm847_vm13, %v942_v62, %v844_v4 }
 0x9dd   :  { %v853_v25 = vsel %vm850_vm15, %v852_v5, %v848_v6 }
 0x9de   :  { %856 = vst.msk [vmem:[%s1314_s12] sm:$0xff] %vm855_vm14, %v853_v25 }

</bundles_post_ra>
